<compile_context>
chip_gen: v5e
topology: v5e:2x2
jax: 0.10.0
libtpu: 0.0.40
codegen_flags: <defaults>
</compile_context>

<pallas_src>
import functools

import jax
import jax.numpy as jnp
from jax.experimental import pallas as pl
from jax.experimental.pallas import tpu as pltpu


# ---------------------------------------------------------------------------
# Hardware-derived defaults
# ---------------------------------------------------------------------------

def _tpu_vmem_capacity_bytes():
    try:
        return int(pltpu.get_tpu_info().vmem_capacity_bytes)
    except Exception:
        return 64 * 1024 * 1024  # conservative (v7x-sized) fallback


_VMEM_CAP = _tpu_vmem_capacity_bytes()
_VMEM_LIMIT = min(int(_VMEM_CAP * 0.6), 100 * 1024 * 1024)   # leave headroom
_BIG_VMEM = _VMEM_CAP >= 100 * 1024 * 1024                    # v5e/v6e: 128 MiB
_DEFAULT_TQ = 512 if _BIG_VMEM else 256
_DEFAULT_TKV = 256
_DEFAULT_TM = 512 if _BIG_VMEM else 256
_DEFAULT_TN = 512


def _pick_tile(dim, preferred, align=8):
    """Largest divisor of `dim` that is <= preferred and `align`-aligned.

    Falls back to the full dimension (always a legal block) only when no
    aligned divisor exists."""
    t = min(preferred, dim)
    if t == dim:
        return dim
    for c in range(t, 0, -1):
        if dim % c == 0 and c % align == 0:
            return c
    return dim


# ---------------------------------------------------------------------------
# Tiled matmul kernels (projections)
# ---------------------------------------------------------------------------

def _matmul_kernel_fullk(x_ref, w_ref, o_ref):
    # Single K block: no accumulator, no pl.when, one long MXU burst.
    o_ref[...] = jnp.dot(
        x_ref[...], w_ref[...], preferred_element_type=jnp.float32
    ).astype(o_ref.dtype)


def _matmul_kernel_acc(x_ref, w_ref, o_ref, acc_ref):
    @pl.when(pl.program_id(2) == 0)
    def _():
        acc_ref[...] = jnp.zeros_like(acc_ref)

    acc_ref[...] += jnp.dot(
        x_ref[...], w_ref[...], preferred_element_type=jnp.float32
    )

    @pl.when(pl.program_id(2) == pl.num_programs(2) - 1)
    def _():
        o_ref[...] = acc_ref[...].astype(o_ref.dtype)


def pallas_matmul(x, w, *, tm=None, tn=None, tk=1024):
    """x: (M, K) @ w: (K, N) -> (M, N); bf16 MXU, f32 accumulation."""
    M, K = x.shape
    K2, N = w.shape
    assert K == K2
    tm = _pick_tile(M, _DEFAULT_TM if tm is None else tm, align=8)
    tn = _pick_tile(N, _DEFAULT_TN if tn is None else tn, align=128)
    cost = pl.CostEstimate(
        flops=2 * M * N * K,
        transcendentals=0,
        bytes_accessed=(M * K + K * N + M * N) * x.dtype.itemsize,
    )

    if K <= tk:  # K fits a single block: collapse grid to 2-D
        return pl.pallas_call(
            _matmul_kernel_fullk,
            out_shape=jax.ShapeDtypeStruct((M, N), x.dtype),
            grid_spec=pltpu.PrefetchScalarGridSpec(
                num_scalar_prefetch=0,
                grid=(M // tm, N // tn),
                in_specs=[
                    pl.BlockSpec((tm, K), lambda i, j: (i, 0)),
                    pl.BlockSpec((K, tn), lambda i, j: (0, j)),
                ],
                out_specs=pl.BlockSpec((tm, tn), lambda i, j: (i, j)),
            ),
            compiler_params=pltpu.CompilerParams(
                dimension_semantics=("parallel", "parallel"),
                vmem_limit_bytes=_VMEM_LIMIT,
            ),
            cost_estimate=cost,
        )(x, w)

    tk = _pick_tile(K, tk, align=128)
    return pl.pallas_call(
        _matmul_kernel_acc,
        out_shape=jax.ShapeDtypeStruct((M, N), x.dtype),
        grid_spec=pltpu.PrefetchScalarGridSpec(
            num_scalar_prefetch=0,
            grid=(M // tm, N // tn, K // tk),
            in_specs=[
                pl.BlockSpec((tm, tk), lambda i, j, k: (i, k)),
                pl.BlockSpec((tk, tn), lambda i, j, k: (k, j)),
            ],
            out_specs=pl.BlockSpec((tm, tn), lambda i, j, k: (i, j)),
            scratch_shapes=[pltpu.VMEM((tm, tn), jnp.float32)],
        ),
        compiler_params=pltpu.CompilerParams(
            dimension_semantics=("parallel", "parallel", "arbitrary"),
            vmem_limit_bytes=_VMEM_LIMIT,
        ),
        cost_estimate=cost,
    )(x, w)


# ---------------------------------------------------------------------------
# Fused QKV projection: one x read, three lane-dense outputs (no JAX slicing)
# ---------------------------------------------------------------------------

def _qkv_proj_kernel(x_ref, wq_ref, wk_ref, wv_ref, q_ref, k_ref, v_ref):
    x = x_ref[...]
    q_ref[...] = jnp.dot(x, wq_ref[...],
                         preferred_element_type=jnp.float32).astype(q_ref.dtype)
    k_ref[...] = jnp.dot(x, wk_ref[...],
                         preferred_element_type=jnp.float32).astype(k_ref.dtype)
    v_ref[...] = jnp.dot(x, wv_ref[...],
                         preferred_element_type=jnp.float32).astype(v_ref.dtype)


def pallas_qkv_proj(x, wq, wk, wv, *, tm=None):
    """Self-attention fast path: (M,D) @ three (D,D) weights -> three (M,D)."""
    M, K = x.shape
    N = wq.shape[1]
    # Fall back to three separate GEMMs if the three resident weights would
    # use too much VMEM.
    if 3 * K * N * wq.dtype.itemsize > _VMEM_LIMIT // 3:
        return pallas_matmul(x, wq), pallas_matmul(x, wk), pallas_matmul(x, wv)

    tm = _pick_tile(M, _DEFAULT_TM if tm is None else tm, align=8)
    out = jax.ShapeDtypeStruct((M, N), x.dtype)
    w_spec = pl.BlockSpec((K, N), lambda i: (0, 0))
    o_spec = pl.BlockSpec((tm, N), lambda i: (i, 0))
    return pl.pallas_call(
        _qkv_proj_kernel,
        out_shape=(out, out, out),
        grid_spec=pltpu.PrefetchScalarGridSpec(
            num_scalar_prefetch=0,
            grid=(M // tm,),
            in_specs=[pl.BlockSpec((tm, K), lambda i: (i, 0)),
                      w_spec, w_spec, w_spec],
            out_specs=(o_spec, o_spec, o_spec),
        ),
        compiler_params=pltpu.CompilerParams(
            dimension_semantics=("parallel",),
            vmem_limit_bytes=_VMEM_LIMIT,
        ),
        cost_estimate=pl.CostEstimate(
            flops=2 * 3 * M * N * K,
            transcendentals=0,
            bytes_accessed=(M * K + 3 * K * N + 3 * M * N) * x.dtype.itemsize,
        ),
    )(x, wq, wk, wv)


# ---------------------------------------------------------------------------
# Flash-style multi-head attention (heads split in-kernel, KV-tile skipping)
# ---------------------------------------------------------------------------

def _mha_flash_kernel(kvb_ref, q_ref, k_ref, v_ref, mask_ref, o_ref,
                      m_scr, l_scr, acc_scr, *, heads, d_k, nq):
    # Block views (batch / broadcast dims squeezed):
    #   q_ref: (tq, D)    k_ref, v_ref: (tkv, D)    mask_ref: (tq, tkv) int8
    #   o_ref: (tq, D)
    # Scratch carried across the innermost KV grid axis:
    #   m_scr, l_scr: (H, tq, 1) f32    acc_scr: (H, tq, d_k) f32
    # kvb_ref (SMEM, scalar-prefetched): #KV blocks with any valid mask entry
    # per (batch, q-tile); trailing fully-masked KV tiles are skipped.
    b = pl.program_id(0)
    qi = pl.program_id(1)
    ki = pl.program_id(2)
    n_valid_kv_blocks = kvb_ref[b * nq + qi]

    @pl.when(ki == 0)
    def _():
        m_scr[...] = jnp.full_like(m_scr, -jnp.inf)
        l_scr[...] = jnp.zeros_like(l_scr)
        acc_scr[...] = jnp.zeros_like(acc_scr)

    @pl.when(ki < n_valid_kv_blocks)
    def _():
        valid = mask_ref[...] != 0                      # (tq, tkv), shared by heads
        neg_big = jnp.float32(-1e9)
        inv_scale = 1.0 / (float(d_k) ** 0.5)

        # TODO(synk): static unroll over heads; for H >= 8 a lax.fori_loop with
        # dynamic lane slicing would bound per-head live ranges further.
        for h in range(heads):
            sl = slice(h * d_k, (h + 1) * d_k)
            # fold 1/sqrt(d_k) into q (cheaper than scaling the (tq,tkv) scores)
            q = q_ref[:, sl] * jnp.asarray(inv_scale, q_ref.dtype)
            # contract on d_k of both operands; no explicit transpose of k
            s = jax.lax.dot_general(
                q, k_ref[:, sl],
                dimension_numbers=(((1,), (1,)), ((), ())),
                preferred_element_type=jnp.float32,
            )                                           # (tq, tkv) f32
            s = jnp.where(valid, s, neg_big)

            m_prev = m_scr[h]                           # (tq, 1)
            m_new = jnp.maximum(m_prev, jnp.max(s, axis=-1, keepdims=True))
            alpha = jnp.exp(m_prev - m_new)             # (tq, 1)
            p = jnp.exp(s - m_new)                      # (tq, tkv)
            l_scr[h] = alpha * l_scr[h] + jnp.sum(p, axis=-1, keepdims=True)
            pv = jax.lax.dot_general(
                p.astype(v_ref.dtype), v_ref[:, sl],
                dimension_numbers=(((1,), (0,)), ((), ())),
                preferred_element_type=jnp.float32,
            )                                           # (tq, d_k)
            acc_scr[h] = alpha * acc_scr[h] + pv
            m_scr[h] = m_new

    @pl.when(ki == pl.num_programs(2) - 1)
    def _():
        outs = []
        for h in range(heads):
            inv_l = pl.reciprocal(l_scr[h], approx=True)   # EUP vrcp
            outs.append(acc_scr[h] * inv_l)                # (tq, d_k)
        # single lane-dense (tq, D) store; output stays in (B, S, D) layout
        o_ref[...] = jnp.concatenate(outs, axis=-1).astype(o_ref.dtype)


def pallas_mha_attention(q, k, v, mask, heads, *, tq=None, tkv=None):
    """q: (B, Sq, D), k/v: (B, Skv, D) projected activations (bf16);
    mask: broadcastable to (B, 1, Sq, Skv), nonzero = attend.
    Returns (B, Sq, D); head split/merge handled inside the kernel."""
    B, Sq, D = q.shape
    Skv = k.shape[1]
    assert D % heads == 0
    d_k = D // heads
    tq = _pick_tile(Sq, _DEFAULT_TQ if tq is None else tq, align=8)
    tkv = _pick_tile(Skv, _DEFAULT_TKV if tkv is None else tkv, align=128)
    nq, nkv = Sq // tq, Skv // tkv

    # int8 mask stream (4x less HBM traffic than int32).
    mask = jnp.broadcast_to(mask, (B, 1, Sq, Skv)).astype(jnp.int8)

    # Per (batch, q-tile): number of KV blocks containing any valid entry
    # (causal masks -> ~half the tiles are skipped).  Clamped to >= 1 so the
    # online-softmax state is always initialized and finalized.
    blk_valid = (mask[:, 0] != 0).reshape(B, nq, tq, nkv, tkv).any(axis=(2, 4))
    last_blk = jnp.max(
        jnp.where(blk_valid, jnp.arange(nkv, dtype=jnp.int32)[None, None, :], -1),
        axis=-1)
    kv_nblocks = jnp.maximum(last_blk + 1, 1).astype(jnp.int32).reshape(B * nq)
    # NOTE: rows whose mask is entirely zero reduce to a uniform average over
    # the *processed* KV tiles (the reference's -1e9 sentinel gives a uniform
    # average over all KV); such fully-padded rows are degenerate either way.

    kernel = functools.partial(_mha_flash_kernel, heads=heads, d_k=d_k, nq=nq)

    def q_map(b, qi, ki, kvb):
        return (b, qi, 0)

    def kv_map(b, qi, ki, kvb):
        # Clamp skipped tiles to the last valid block index: the repeated
        # block index suppresses re-DMA of K/V for skipped iterations.
        return (b, jnp.minimum(ki, kvb[b * nq + qi] - 1), 0)

    def mask_map(b, qi, ki, kvb):
        return (b, 0, qi, jnp.minimum(ki, kvb[b * nq + qi] - 1))

    return pl.pallas_call(
        kernel,
        out_shape=jax.ShapeDtypeStruct((B, Sq, D), q.dtype),
        grid_spec=pltpu.PrefetchScalarGridSpec(
            num_scalar_prefetch=1,
            grid=(B, nq, nkv),
            in_specs=[
                pl.BlockSpec((None, tq, D), q_map),
                pl.BlockSpec((None, tkv, D), kv_map),
                pl.BlockSpec((None, tkv, D), kv_map),
                pl.BlockSpec((None, None, tq, tkv), mask_map),
            ],
            out_specs=pl.BlockSpec((None, tq, D), q_map),
            scratch_shapes=[
                pltpu.VMEM((heads, tq, 1), jnp.float32),     # running row max
                pltpu.VMEM((heads, tq, 1), jnp.float32),     # running denom
                pltpu.VMEM((heads, tq, d_k), jnp.float32),   # output accumulator
            ],
        ),
        compiler_params=pltpu.CompilerParams(
            dimension_semantics=("parallel", "parallel", "arbitrary"),
            vmem_limit_bytes=_VMEM_LIMIT,
        ),
        cost_estimate=pl.CostEstimate(
            flops=4 * B * Sq * Skv * D,
            transcendentals=B * heads * Sq * Skv,
            bytes_accessed=(2 * B * Sq * D + 2 * B * Skv * D) * q.dtype.itemsize
                           + B * Sq * Skv,
        ),
    )(kv_nblocks, q, k, v, mask)


# ---------------------------------------------------------------------------
# MultiHeadAttention forward (glue in plain JAX, hot path in Pallas)
# ---------------------------------------------------------------------------

class MultiHeadAttentionPallas:
    def __init__(self, d_model, heads, key, dtype=jnp.bfloat16):
        assert d_model % heads == 0, "d_model must be divisible by the number of heads"
        self.d_model = d_model
        self.h = heads
        self.d_k = d_model // heads
        self.dtype = dtype

        k1, k2, k3, k4 = jax.random.split(key, 4)
        # nn.Linear weight is (out, in); store the transposed (in, out) so the
        # forward is x @ W.  Weights kept in bf16 for the MXU.
        def init(kk):
            w = jax.random.uniform(kk, (d_model, d_model), jnp.float32,
                                   minval=-1.0, maxval=1.0)
            return (w / jnp.sqrt(jnp.float32(d_model))).astype(dtype)

        self.w_q = init(k1)
        self.w_k = init(k2)
        self.w_v = init(k3)
        self.w_out = init(k4)
        # TODO(synk): nn.Dropout is declared in the PyTorch module but never
        # applied in its forward(), so it is intentionally omitted here.

    def __call__(self, q, k, v, mask):
        B, Sq, D = q.shape
        same = (q is k) and (k is v)

        q = q.astype(self.dtype)
        k = q if same else k.astype(self.dtype)
        v = q if same else v.astype(self.dtype)

        if same:
            # self-attention: one fused projection (reads activations once,
            # writes q/k/v directly — no JAX-level slices of a fused buffer)
            q_p, k_p, v_p = pallas_qkv_proj(q.reshape(B * Sq, D),
                                            self.w_q, self.w_k, self.w_v)
            q_p = q_p.reshape(B, Sq, D)
            k_p = k_p.reshape(B, Sq, D)
            v_p = v_p.reshape(B, Sq, D)
        else:
            Skv = k.shape[1]
            q_p = pallas_matmul(q.reshape(B * Sq, D), self.w_q).reshape(B, Sq, D)
            k_p = pallas_matmul(k.reshape(B * Skv, D), self.w_k).reshape(B, Skv, D)
            v_p = pallas_matmul(v.reshape(B * Skv, D), self.w_v).reshape(B, Skv, D)

        # Flash-style attention directly on (B, S, D) — no head transposes.
        x = pallas_mha_attention(q_p, k_p, v_p, mask, self.h)

        # Output projection.
        return pallas_matmul(x.reshape(B * Sq, D), self.w_out).reshape(B, Sq, D)


# ---------------------------------------------------------------------------
# Pure-JAX reference (mirrors the bf16 rounding points of the kernels)
# ---------------------------------------------------------------------------

def reference_forward(mha, q, k, v, mask):
    B, S, D = q.shape
    H, d_k, dt = mha.h, mha.d_k, mha.dtype
    f32 = jnp.float32
    q = q.astype(dt)
    k = k.astype(dt)
    v = v.astype(dt)

    def proj(x, w):
        y = jnp.dot(x.reshape(-1, D), w, preferred_element_type=f32)
        return y.astype(dt)

    q_p = proj(q, mha.w_q).reshape(B, S, H, d_k).transpose(0, 2, 1, 3)
    k_p = proj(k, mha.w_k).reshape(B, S, H, d_k).transpose(0, 2, 1, 3)
    v_p = proj(v, mha.w_v).reshape(B, S, H, d_k).transpose(0, 2, 1, 3)
    scores = jnp.einsum("bhqd,bhkd->bhqk", q_p, k_p,
                        preferred_element_type=f32) / (float(d_k) ** 0.5)
    scores = jnp.where(mask != 0, scores, f32(-1e9))
    attn = jax.nn.softmax(scores, axis=-1).astype(dt)
    x = jnp.einsum("bhqk,bhkd->bhqd", attn, v_p,
                   preferred_element_type=f32).astype(dt)
    x = x.transpose(0, 2, 1, 3).reshape(B * S, D)
    out = jnp.dot(x, mha.w_out, preferred_element_type=f32)
    return out.reshape(B, S, D)


# ---------------------------------------------------------------------------
# Main
# ---------------------------------------------------------------------------

if __name__ == "__main__":
    key = jax.random.PRNGKey(0)
    k_param, k_q, k_k, k_v = jax.random.split(key, 4)

    B, S, d_model, heads = 2, 8, 32, 4

    mha = MultiHeadAttentionPallas(d_model, heads, k_param)

    q = jax.random.normal(k_q, (B, S, d_model), jnp.float32)
    k = jax.random.normal(k_k, (B, S, d_model), jnp.float32)
    v = jax.random.normal(k_v, (B, S, d_model), jnp.float32)

    # Causal mask (B, 1, S, S): 1 = attend, 0 = masked.
    causal = jnp.tril(jnp.ones((S, S), jnp.int32))
    mask = jnp.broadcast_to(causal[None, None], (B, 1, S, S))

    def check(out, ref, name):
        out32 = out.astype(jnp.float32)
        ref32 = ref.astype(jnp.float32)
        err = float(jnp.max(jnp.abs(out32 - ref32)))
        assert jnp.allclose(out32, ref32, atol=2e-2, rtol=2e-2), (
            f"{name} mismatch (max abs err {err})")

    # Cross-attention path (distinct q/k/v -> three projection GEMMs).
    out = jax.block_until_ready(mha(q, k, v, mask))
    assert out.shape == (B, S, d_model)
    check(out, reference_forward(mha, q, k, v, mask), "cross-attn")

    # Self-attention path (q is k is v -> fused QKV projection).
    out_sa = jax.block_until_ready(mha(q, q, q, mask))
    check(out_sa, reference_forward(mha, q, q, q, mask), "self-attn")

    print("KERNEL_OK")
</pallas_src>

<mosaic_0001>
module attributes {stable_mosaic.version = 11 : i64} {
  func.func @_matmul_kernel_fullk(%arg0: i32, %arg1: i32, %arg2: memref<16x32xbf16, #tpu.memory_space<vmem>>, %arg3: memref<32x32xbf16, #tpu.memory_space<vmem>>, %arg4: memref<16x32xbf16, #tpu.memory_space<vmem>>) attributes {dimension_semantics = [#tpu.dimension_semantics<parallel>, #tpu.dimension_semantics<parallel>], iteration_bounds = array<i64: 1, 1>, scalar_prefetch = 0 : i64, scratch_operands = 0 : i64, tpu.core_type = #tpu.core_type<tc>, window_params = [{transform_indices = @transform_0, window_bounds = array<i64: 16, 32>}, {transform_indices = @transform_1, window_bounds = array<i64: 32, 32>}, {transform_indices = @transform_2, window_bounds = array<i64: 16, 32>}]} {
    %c0 = arith.constant 0 : index
    %c0_0 = arith.constant 0 : index
    %0 = vector.load %arg2[%c0, %c0_0] : memref<16x32xbf16, #tpu.memory_space<vmem>>, vector<16x32xbf16>
    %c0_1 = arith.constant 0 : index
    %c0_2 = arith.constant 0 : index
    %1 = vector.load %arg3[%c0_1, %c0_2] : memref<32x32xbf16, #tpu.memory_space<vmem>>, vector<32x32xbf16>
    %cst = arith.constant dense<0.000000e+00> : vector<16x32xf32>
    %2 = tpu.matmul %0, %1, %cst {dimension_numbers = #tpu.dot_dimension_numbers<[1], [0], [0], [1], [0, 0, 1, 1], [], []>} : vector<16x32xbf16>, vector<32x32xbf16>, vector<16x32xf32> -> vector<16x32xf32>
    %3 = arith.truncf %2 : vector<16x32xf32> to vector<16x32xbf16>
    %c0_3 = arith.constant 0 : index
    %c0_4 = arith.constant 0 : index
    %4 = vector.load %arg4[%c0_3, %c0_4] : memref<16x32xbf16, #tpu.memory_space<vmem>>, vector<16x32xbf16>
    tpu.vector_store %arg4[%c0_3, %c0_4], %3 {strides = array<i32>} : memref<16x32xbf16, #tpu.memory_space<vmem>>, vector<16x32xbf16>,
    return
  }
  func.func @transform_0(%arg0: i32, %arg1: i32) -> (i32, i32) {
    %c0_i32 = arith.constant 0 : i32
    %c0_i32_0 = arith.constant 0 : i32
    return %arg0, %c0_i32 : i32, i32
  }
  func.func @transform_1(%arg0: i32, %arg1: i32) -> (i32, i32) {
    %c0_i32 = arith.constant 0 : i32
    %c0_i32_0 = arith.constant 0 : i32
    return %c0_i32, %arg1 : i32, i32
  }
  func.func @transform_2(%arg0: i32, %arg1: i32) -> (i32, i32) {
    %c0_i32 = arith.constant 0 : i32
    return %arg0, %arg1 : i32, i32
  }
}

</mosaic_0001>

<bundles_post_ra>
// kernel: tpu_custom_call.1
= control target key start
LH: loop header
LB: loop body
LE: loop exit
PB: predicated region body
PF: predicated region fallthrough
CT: control target
= control target key end

     0   :  { %7 = vsyncpa [#allocation3], 0  ;;  %s248_s0 = inlined_call_operand.hbm [shape: bf16[16,32], index: 0, kind: input, shape index: {}]   ;;  %s249_s1 = inlined_call_operand.hbm [shape: bf16[32,32], index: 1, kind: input, shape index: {}]   ;;  %s250_s2 = inlined_call_operand.hbm [shape: bf16[16,32], index: 2, kind: output, shape index: {}]  }
   0x1   :  { %8 = vsyncpa [#allocation6], 0 }
   0x2   :  { %9 = vsyncpa [#allocation4], 0  ;;  %s14_s11 = sshll.u32 %s248_s0, 4  ;;  %s210_s12 = smov [#allocation2]   ;;  %s15_s11 = int_to_ptr.hbm [resolvable:$true] %s14_s11 }
   0x3   :  { %s16_s13 = sshll.u32 %s210_s12, 4  ;;  %s27_s16 = sshll.u32 %s249_s1, 4  ;;  %s17_s13 = int_to_ptr.vmem [resolvable:$true] %s16_s13  ;;  %s28_s16 = int_to_ptr.hbm [resolvable:$true] %s27_s16 }
   0x4   :  { %s211_s17 = smov 64   ;;  %s212_s18 = smov 4  }
   0x5   :  { %22 = dma.hbm_to_vmem [thread:$0]  %s15_s11, 128, %s17_s13, [#allocation3], %s211_s17, %s211_s17, %s212_s18  }
   0x6   :  { %s213_s19 = smov [#allocation5]  }
   0x7   :  { %s29_s20 = sshll.u32 %s213_s19, 4  ;;  %s30_s20 = int_to_ptr.vmem [resolvable:$true] %s29_s20 }
   0x8   :  { %35 = dma.hbm_to_vmem [thread:$0]  %s28_s16, 256, %s30_s20, [#allocation6], %s211_s17, %s211_s17, %s212_s18  }
   0x9   :  { %204 = dma.done.wait [#allocation3], 128  }
   0xa   :  { %205 = vsyncadd [#allocation3], 4294967168 }
   0xb   :  { %206 = dma.done.wait [#allocation6], 256  }
   0xc   :  { %207 = vsyncadd [#allocation6], 4294967040  ;;  %v126_v0 = vld [vmem:[#allocation5 + $0x8] sm:$0xff]  ;;  %v125_v1 = vld [vmem:[#allocation5] sm:$0xff]  ;;  %vm68_vm0 = vcmask 261120   ;;  %vm88_vm1 = vcmask 257024  }
   0xd   :  { %78 = vmatpush.bf16.msra.mxu0 %v126_v0  ;;  %v124_v2 = vld [vmem:[#allocation2] sm:$0xff]  ;;  %s214_s0 = smov [#allocation7]   ;;  %s97_s23 = sshll.u32 %s250_s2, 4  ;;  %s98_s23 = int_to_ptr.hbm [resolvable:$true] %s97_s23 }
   0xe   :  { %s95_s1 = sshll.u32 %s214_s0, 4  ;;  %s96_s1 = int_to_ptr.vmem [resolvable:$true] %s95_s1 }
  0x11   :  { %79 = vmatpush.bf16.msra.mxu0 %v125_v1 }
  0x14   :  { %123 = vmatmul.msk.bf16.vlgmr.msra.gmra.mxu0 %vm68_vm0, %v124_v2 }
  0x91   :  { %v81_v3 = vpop.f32.mrf.mxu0 }
  0x92   :  { %v86_v4 = vpack.c.bf16 %v81_v3, %v81_v3 }
  0x94   :  { %89 = vst.msk [vmem:[#allocation7] sm:$0xf] %vm88_vm1, %v86_v4 }
  0x99   :  { %v83_v5 = vpop.f32.mrf.mxu0 }
  0x9a   :  { %v87_v6 = vpack.c.bf16 %v83_v5, %v83_v5 }
  0x9c   :  { %90 = vst.msk [vmem:[#allocation7 + $0x4] sm:$0xf] %vm88_vm1, %v87_v6 }
  0x9d   :  { %103 = dma.vmem_to_hbm [thread:$0]  %s96_s1, 128, %s98_s23, [#allocation4], %s211_s17, %s211_s17, %s212_s18  }
  0x9e   :  { %208 = dma.done.wait [#allocation4], 128  }
  0x9f   :  { %209 = vsyncadd [#allocation4], 4294967168 }
  0xa0   :  { %108 = vsyncpa [#allocation3], 1 }
  0xa1   :  { %109 = vsyncpa [#allocation6], 1 }
  0xa2   :  { %110 = vsyncpa [#allocation4], 1 }

</bundles_post_ra>
